<compile_context>
chip_gen: v5e
topology: v5e:2x2
jax: 0.10.0
libtpu: 0.0.40
codegen_flags: <defaults>
</compile_context>

<pallas_src>
import jax
import jax.numpy as jnp
from jax.experimental import pallas as pl
from jax.experimental.pallas import tpu as pltpu

# Contract dim 1 of both operands: lhs (8,64) x rhs (TB,64) -> (8,TB)
# (same dimension-numbers pattern as q @ k.T in flash attention).
_TRANS_B_DIMS = (((1,), (1,)), ((), ()))


def _round_up(n, m):
    return ((n + m - 1) // m) * m


def mlp_kernel(x_ref, w1_ref, b1_ref, w2_ref, b2_ref,
               w3_ref, b3_ref, w4_ref, b4_ref, o_ref):
    # In-kernel bf16 cast of the streamed x block (hides under the MXU).
    x = x_ref[...].astype(jnp.bfloat16)

    # Layer 1: (TB, d_in)bf16 @ (d_in, 256)bf16 -> f32 acc, +bias, ReLU
    h = jnp.dot(x, w1_ref[...], preferred_element_type=jnp.float32)
    h = jnp.maximum(h + b1_ref[...], 0.0)
    # Dropout(0.3): identity in eval mode.

    # Layer 2: (TB, 256) @ (256, 128)
    h = jnp.dot(h.astype(jnp.bfloat16), w2_ref[...],
                preferred_element_type=jnp.float32)
    h = jnp.maximum(h + b2_ref[...], 0.0)
    # Dropout(0.3): identity in eval mode.

    # Layer 3: (TB, 128) @ (128, 64)
    h = jnp.dot(h.astype(jnp.bfloat16), w3_ref[...],
                preferred_element_type=jnp.float32)
    h = jnp.maximum(h + b3_ref[...], 0.0)          # (TB, 64) f32

    # Layer 4: lane-dense output.  w4 is (8, 64) bf16 (row 0 real, rest 0);
    # contract the 64-feature axis of both operands -> (8, TB), bf16 MXU
    # inputs with f32 accumulation, no transpose of h.
    out8 = jax.lax.dot_general(w4_ref[...], h.astype(jnp.bfloat16),
                               _TRANS_B_DIMS,
                               preferred_element_type=jnp.float32)
    # Store all 8 sublanes (unmasked vst); only row 0 is meaningful.
    o_ref[...] = (out8 + b4_ref[...]).astype(o_ref.dtype)


def _pick_tile_b(B, d_in, vmem_budget, n_buf):
    """Largest 128-multiple batch tile that fits the VMEM budget, while
    guaranteeing >=2 grid steps whenever B allows it (v7x megacore +
    x-tile pipelining)."""
    # Resident (single-buffered) bf16 weights + f32 biases.
    resident = 2 * (d_in * 256 + 256 * 128 + 128 * 64 + 8 * 64) \
               + 4 * (256 + 128 + 64 + 1)
    # Per-row, per-step: n_buf f32 x buffers, f32 activations, bf16 recasts
    # feeding the MXU, double-buffered (8, tile) f32 output.
    per_row = (n_buf * d_in * 4
               + (256 + 128 + 64) * 4
               + (256 + 128 + 64) * 2
               + 2 * 8 * 4)
    avail = max(vmem_budget - resident, 128 * per_row)
    max_rows = max((avail // per_row // 128) * 128, 128)
    tile = min(_round_up(B, 128),               # no bigger than needed
               _round_up(-(-B // 2), 128),      # >= 2 grid steps when B > 128
               max_rows,                        # VMEM budget
               8192)                            # amortizes per-step overhead
    return max(tile, 128)


def mlp_forward(x, params, tile_b=None, vmem_budget=None):
    """x: (B, d_in) float32. params: w{1..4} as (in,out), b{1..4} as (1,out)."""
    B, d_in = x.shape

    if vmem_budget is None:
        try:
            cap = int(pltpu.get_tpu_info().vmem_capacity_bytes)
        except Exception:
            cap = 64 << 20  # conservative (v7x physical VMEM per TC)
        vmem_budget = (cap * 3) // 4   # ~48 MiB on v7x, ~96 MiB on v5e/v6e

    n_buf = 3 if d_in >= 512 else 2    # deepen x pipeline only for wide inputs
    if tile_b is None:
        tile_b = _pick_tile_b(B, d_in, vmem_budget, n_buf)
    b_pad = _round_up(B, tile_b)
    n_tiles = b_pad // tile_b

    # Stream x as-is (f32); pad only if needed, cast to bf16 inside the kernel.
    x_p = x if b_pad == B else jnp.pad(x, ((0, b_pad - B), (0, 0)))

    bf16 = jnp.bfloat16
    w1 = params["w1"].astype(bf16)
    w2 = params["w2"].astype(bf16)
    w3 = params["w3"].astype(bf16)
    # w4 (64,1) -> (8,64) bf16, row 0 = w4^T, rows 1..7 zero (avoids M=1 matmul).
    w4 = jnp.zeros((8, 64), bf16).at[0:1, :].set(params["w4"].T.astype(bf16))
    b1, b2, b3, b4 = params["b1"], params["b2"], params["b3"], params["b4"]

    args = (x_p, w1, b1, w2, b2, w3, b3, w4, b4)

    def const_spec(a):  # whole array, VMEM-resident across the grid
        return pl.BlockSpec(a.shape, lambda i: (0, 0))

    if n_buf == 2:
        x_spec = pl.BlockSpec((tile_b, d_in), lambda i: (i, 0))
    else:
        x_spec = pl.BlockSpec((tile_b, d_in), lambda i: (i, 0),
                              pipeline_mode=pl.Buffered(n_buf))

    in_specs = [x_spec] + [const_spec(a) for a in args[1:]]
    out_specs = pl.BlockSpec((8, tile_b), lambda i: (0, i))

    flops = 2 * b_pad * (d_in * 256 + 256 * 128 + 128 * 64 + 64 * 8)
    param_bytes = sum(int(a.size) * a.dtype.itemsize for a in args[1:])
    bytes_accessed = (int(x_p.size) * x_p.dtype.itemsize + param_bytes
                      + 8 * b_pad * 4)

    out8 = pl.pallas_call(
        mlp_kernel,
        out_shape=jax.ShapeDtypeStruct((8, b_pad), jnp.float32),
        grid=(n_tiles,),
        in_specs=in_specs,
        out_specs=out_specs,
        compiler_params=pltpu.CompilerParams(
            dimension_semantics=("parallel",),
            vmem_limit_bytes=int(vmem_budget)),
        cost_estimate=pl.CostEstimate(
            flops=flops, transcendentals=0, bytes_accessed=bytes_accessed),
    )(*args)

    # Row 0 of the (8, b_pad) lane-dense result -> (B, 1) column, drop padding.
    return out8[0, :B].reshape(B, 1)


def init_params(key, d_in):
    """PyTorch nn.Linear default init: U(-1/sqrt(fan_in), 1/sqrt(fan_in)).
    Weights stored as (in, out); biases as (1, out)."""
    dims = [(d_in, 256), (256, 128), (128, 64), (64, 1)]
    params = {}
    keys = jax.random.split(key, 2 * len(dims))
    for i, (fi, fo) in enumerate(dims):
        bound = 1.0 / (fi ** 0.5)
        params[f"w{i + 1}"] = jax.random.uniform(
            keys[2 * i], (fi, fo), jnp.float32, minval=-bound, maxval=bound)
        params[f"b{i + 1}"] = jax.random.uniform(
            keys[2 * i + 1], (1, fo), jnp.float32, minval=-bound, maxval=bound)
    return params


def _reference_forward(x, p):
    """Plain-JAX reference with the same bf16-matmul / f32-accumulate recipe."""
    bf16 = jnp.bfloat16
    h = jnp.maximum(jnp.dot(x.astype(bf16), p["w1"].astype(bf16),
                            preferred_element_type=jnp.float32) + p["b1"], 0.0)
    h = jnp.maximum(jnp.dot(h.astype(bf16), p["w2"].astype(bf16),
                            preferred_element_type=jnp.float32) + p["b2"], 0.0)
    h = jnp.maximum(jnp.dot(h.astype(bf16), p["w3"].astype(bf16),
                            preferred_element_type=jnp.float32) + p["b3"], 0.0)
    return jnp.dot(h.astype(bf16), p["w4"].astype(bf16),
                   preferred_element_type=jnp.float32) + p["b4"]


if __name__ == "__main__":
    key = jax.random.PRNGKey(0)
    k_x, k_p = jax.random.split(key)

    B, d_in = 8, 32
    x = jax.random.normal(k_x, (B, d_in), dtype=jnp.float32)
    params = init_params(k_p, d_in)

    out = mlp_forward(x, params)
    jax.block_until_ready(out)

    ref = _reference_forward(x, params)
    assert out.shape == (B, 1)
    assert jnp.allclose(out, ref, atol=1e-2, rtol=1e-2), (out, ref)

    print("KERNEL_OK")
</pallas_src>

<mosaic_0001>
module attributes {stable_mosaic.version = 11 : i64} {
  func.func @mlp_kernel(%arg0: i32, %arg1: memref<128x32xf32, #tpu.memory_space<vmem>>, %arg2: memref<32x256xbf16, #tpu.memory_space<vmem>>, %arg3: memref<1x256xf32, #tpu.memory_space<vmem>>, %arg4: memref<256x128xbf16, #tpu.memory_space<vmem>>, %arg5: memref<1x128xf32, #tpu.memory_space<vmem>>, %arg6: memref<128x64xbf16, #tpu.memory_space<vmem>>, %arg7: memref<1x64xf32, #tpu.memory_space<vmem>>, %arg8: memref<8x64xbf16, #tpu.memory_space<vmem>>, %arg9: memref<1x1xf32, #tpu.memory_space<vmem>>, %arg10: memref<8x128xf32, #tpu.memory_space<vmem>>) attributes {dimension_semantics = [#tpu.dimension_semantics<parallel>], iteration_bounds = array<i64: 1>, scalar_prefetch = 0 : i64, scratch_operands = 0 : i64, tpu.core_type = #tpu.core_type<tc>, window_params = [{transform_indices = @transform_0, window_bounds = array<i64: 128, 32>}, {pipeline_mode = #tpu.pipeline_mode<synchronous>, transform_indices = @transform_1, window_bounds = array<i64: 32, 256>}, {pipeline_mode = #tpu.pipeline_mode<synchronous>, transform_indices = @transform_2, window_bounds = array<i64: 1, 256>}, {pipeline_mode = #tpu.pipeline_mode<synchronous>, transform_indices = @transform_3, window_bounds = array<i64: 256, 128>}, {pipeline_mode = #tpu.pipeline_mode<synchronous>, transform_indices = @transform_4, window_bounds = array<i64: 1, 128>}, {pipeline_mode = #tpu.pipeline_mode<synchronous>, transform_indices = @transform_5, window_bounds = array<i64: 128, 64>}, {pipeline_mode = #tpu.pipeline_mode<synchronous>, transform_indices = @transform_6, window_bounds = array<i64: 1, 64>}, {pipeline_mode = #tpu.pipeline_mode<synchronous>, transform_indices = @transform_7, window_bounds = array<i64: 8, 64>}, {pipeline_mode = #tpu.pipeline_mode<synchronous>, transform_indices = @transform_8, window_bounds = array<i64: 1, 1>}, {transform_indices = @transform_9, window_bounds = array<i64: 8, 128>}]} {
    %c0 = arith.constant 0 : index
    %c0_0 = arith.constant 0 : index
    %0 = vector.load %arg1[%c0, %c0_0] : memref<128x32xf32, #tpu.memory_space<vmem>>, vector<128x32xf32>
    %1 = arith.truncf %0 : vector<128x32xf32> to vector<128x32xbf16>
    %c0_1 = arith.constant 0 : index
    %c0_2 = arith.constant 0 : index
    %2 = vector.load %arg2[%c0_1, %c0_2] : memref<32x256xbf16, #tpu.memory_space<vmem>>, vector<32x256xbf16>
    %cst = arith.constant dense<0.000000e+00> : vector<128x256xf32>
    %3 = tpu.matmul %1, %2, %cst {dimension_numbers = #tpu.dot_dimension_numbers<[1], [0], [0], [1], [0, 0, 1, 1], [], []>} : vector<128x32xbf16>, vector<32x256xbf16>, vector<128x256xf32> -> vector<128x256xf32>
    %c0_3 = arith.constant 0 : index
    %c0_4 = arith.constant 0 : index
    %4 = vector.load %arg3[%c0_3, %c0_4] : memref<1x256xf32, #tpu.memory_space<vmem>>, vector<1x256xf32>
    %5 = vector.broadcast %4 : vector<1x256xf32> to vector<128x256xf32>
    %6 = arith.addf %3, %5 : vector<128x256xf32>
    %cst_5 = arith.constant 0.000000e+00 : f32
    %7 = vector.broadcast %cst_5 : f32 to vector<128x256xf32>
    %8 = arith.maximumf %6, %7 : vector<128x256xf32>
    %9 = arith.truncf %8 : vector<128x256xf32> to vector<128x256xbf16>
    %c0_6 = arith.constant 0 : index
    %c0_7 = arith.constant 0 : index
    %10 = vector.load %arg4[%c0_6, %c0_7] : memref<256x128xbf16, #tpu.memory_space<vmem>>, vector<256x128xbf16>
    %cst_8 = arith.constant dense<0.000000e+00> : vector<128x128xf32>
    %11 = tpu.matmul %9, %10, %cst_8 {dimension_numbers = #tpu.dot_dimension_numbers<[1], [0], [0], [1], [0, 0, 1, 1], [], []>} : vector<128x256xbf16>, vector<256x128xbf16>, vector<128x128xf32> -> vector<128x128xf32>
    %c0_9 = arith.constant 0 : index
    %c0_10 = arith.constant 0 : index
    %12 = vector.load %arg5[%c0_9, %c0_10] : memref<1x128xf32, #tpu.memory_space<vmem>>, vector<1x128xf32>
    %13 = vector.broadcast %12 : vector<1x128xf32> to vector<128x128xf32>
    %14 = arith.addf %11, %13 : vector<128x128xf32>
    %cst_11 = arith.constant 0.000000e+00 : f32
    %15 = vector.broadcast %cst_11 : f32 to vector<128x128xf32>
    %16 = arith.maximumf %14, %15 : vector<128x128xf32>
    %17 = arith.truncf %16 : vector<128x128xf32> to vector<128x128xbf16>
    %c0_12 = arith.constant 0 : index
    %c0_13 = arith.constant 0 : index
    %18 = vector.load %arg6[%c0_12, %c0_13] : memref<128x64xbf16, #tpu.memory_space<vmem>>, vector<128x64xbf16>
    %cst_14 = arith.constant dense<0.000000e+00> : vector<128x64xf32>
    %19 = tpu.matmul %17, %18, %cst_14 {dimension_numbers = #tpu.dot_dimension_numbers<[1], [0], [0], [1], [0, 0, 1, 1], [], []>} : vector<128x128xbf16>, vector<128x64xbf16>, vector<128x64xf32> -> vector<128x64xf32>
    %c0_15 = arith.constant 0 : index
    %c0_16 = arith.constant 0 : index
    %20 = vector.load %arg7[%c0_15, %c0_16] : memref<1x64xf32, #tpu.memory_space<vmem>>, vector<1x64xf32>
    %21 = vector.broadcast %20 : vector<1x64xf32> to vector<128x64xf32>
    %22 = arith.addf %19, %21 : vector<128x64xf32>
    %cst_17 = arith.constant 0.000000e+00 : f32
    %23 = vector.broadcast %cst_17 : f32 to vector<128x64xf32>
    %24 = arith.maximumf %22, %23 : vector<128x64xf32>
    %c0_18 = arith.constant 0 : index
    %c0_19 = arith.constant 0 : index
    %25 = vector.load %arg8[%c0_18, %c0_19] : memref<8x64xbf16, #tpu.memory_space<vmem>>, vector<8x64xbf16>
    %26 = arith.truncf %24 : vector<128x64xf32> to vector<128x64xbf16>
    %cst_20 = arith.constant dense<0.000000e+00> : vector<8x128xf32>
    %27 = tpu.matmul %25, %26, %cst_20 {dimension_numbers = #tpu.dot_dimension_numbers<[1], [1], [0], [0], [0, 0, 1, 0], [], []>} : vector<8x64xbf16>, vector<128x64xbf16>, vector<8x128xf32> -> vector<8x128xf32>
    %c0_21 = arith.constant 0 : index
    %c0_22 = arith.constant 0 : index
    %28 = vector.load %arg9[%c0_21, %c0_22] : memref<1x1xf32, #tpu.memory_space<vmem>>, vector<1x1xf32>
    %29 = vector.broadcast %28 : vector<1x1xf32> to vector<8x128xf32>
    %30 = arith.addf %27, %29 : vector<8x128xf32>
    %c0_23 = arith.constant 0 : index
    %c0_24 = arith.constant 0 : index
    %31 = vector.load %arg10[%c0_23, %c0_24] : memref<8x128xf32, #tpu.memory_space<vmem>>, vector<8x128xf32>
    tpu.vector_store %arg10[%c0_23, %c0_24], %30 {strides = array<i32>} : memref<8x128xf32, #tpu.memory_space<vmem>>, vector<8x128xf32>,
    return
  }
  func.func @transform_0(%arg0: i32) -> (i32, i32) {
    %c0_i32 = arith.constant 0 : i32
    %c0_i32_0 = arith.constant 0 : i32
    return %arg0, %c0_i32 : i32, i32
  }
  func.func @transform_1(%arg0: i32) -> (i32, i32) {
    %c0_i32 = arith.constant 0 : i32
    %c0_i32_0 = arith.constant 0 : i32
    %c0_i32_1 = arith.constant 0 : i32
    return %c0_i32, %c0_i32_0 : i32, i32
  }
  func.func @transform_2(%arg0: i32) -> (i32, i32) {
    %c0_i32 = arith.constant 0 : i32
    %c0_i32_0 = arith.constant 0 : i32
    %c0_i32_1 = arith.constant 0 : i32
    return %c0_i32, %c0_i32_0 : i32, i32
  }
  func.func @transform_3(%arg0: i32) -> (i32, i32) {
    %c0_i32 = arith.constant 0 : i32
    %c0_i32_0 = arith.constant 0 : i32
    %c0_i32_1 = arith.constant 0 : i32
    return %c0_i32, %c0_i32_0 : i32, i32
  }
  func.func @transform_4(%arg0: i32) -> (i32, i32) {
    %c0_i32 = arith.constant 0 : i32
    %c0_i32_0 = arith.constant 0 : i32
    %c0_i32_1 = arith.constant 0 : i32
    return %c0_i32, %c0_i32_0 : i32, i32
  }
  func.func @transform_5(%arg0: i32) -> (i32, i32) {
    %c0_i32 = arith.constant 0 : i32
    %c0_i32_0 = arith.constant 0 : i32
    %c0_i32_1 = arith.constant 0 : i32
    return %c0_i32, %c0_i32_0 : i32, i32
  }
  func.func @transform_6(%arg0: i32) -> (i32, i32) {
    %c0_i32 = arith.constant 0 : i32
    %c0_i32_0 = arith.constant 0 : i32
    %c0_i32_1 = arith.constant 0 : i32
    return %c0_i32, %c0_i32_0 : i32, i32
  }
  func.func @transform_7(%arg0: i32) -> (i32, i32) {
    %c0_i32 = arith.constant 0 : i32
    %c0_i32_0 = arith.constant 0 : i32
    %c0_i32_1 = arith.constant 0 : i32
    return %c0_i32, %c0_i32_0 : i32, i32
  }
  func.func @transform_8(%arg0: i32) -> (i32, i32) {
    %c0_i32 = arith.constant 0 : i32
    %c0_i32_0 = arith.constant 0 : i32
    %c0_i32_1 = arith.constant 0 : i32
    return %c0_i32, %c0_i32_0 : i32, i32
  }
  func.func @transform_9(%arg0: i32) -> (i32, i32) {
    %c0_i32 = arith.constant 0 : i32
    %c0_i32_0 = arith.constant 0 : i32
    return %c0_i32, %arg0 : i32, i32
  }
}

</mosaic_0001>

<bundles_post_ra>
// kernel: tpu_custom_call.1
= control target key start
LH: loop header
LB: loop body
LE: loop exit
PB: predicated region body
PF: predicated region fallthrough
CT: control target
= control target key end

     0   :  { %s1213_s0 = inlined_call_operand.vmem [shape: f32[128,32], index: 0, kind: input, shape index: {}]   ;;  %s1214_s1 = inlined_call_operand.vmem [shape: bf16[32,256], index: 1, kind: input, shape index: {}]   ;;  %s1215_s2 = inlined_call_operand.vmem [shape: f32[1,256], index: 2, kind: input, shape index: {}]   ;;  %s1216_s3 = inlined_call_operand.vmem [shape: bf16[256,128], index: 3, kind: input, shape index: {}]   ;;  %s1217_s4 = inlined_call_operand.vmem [shape: f32[1,128], index: 4, kind: input, shape index: {}]   ;;  %s1218_s5 = inlined_call_operand.vmem [shape: bf16[128,64], index: 5, kind: input, shape index: {}]   ;;  %s1219_s6 = inlined_call_operand.vmem [shape: f32[1,64], index: 6, kind: input, shape index: {}]   ;;  %s1220_s7 = inlined_call_operand.vmem [shape: bf16[8,64], index: 7, kind: input, shape index: {}]   ;;  %s1221_s8 = inlined_call_operand.<no memory space> [shape: f32[1,1], index: 8, kind: input, shape index: {}]   ;;  %s1222_s9 = inlined_call_operand.hbm [shape: f32[8,128], index: 9, kind: output, shape index: {}]  }
   0x1   :  { %v14_v0 = vstv %s1221_s8 }
   0x2   :  { %15 = vst [vmem:[#allocation2] sm:$0x1] %v14_v0 }
   0x3   :  { %v732_v1 = vld [vmem:[%s1214_s1 + $0x10] sm:$0xf]  ;;  %v854_v2 = vld [vmem:[%s1214_s1 + $0x14] sm:$0xf0]  ;;  %v724_v3 = vld [vmem:[%s1214_s1] sm:$0xf] }
   0x4   :  { %v733_v4 = vor.u32 %v854_v2, %v732_v1  ;;  %v852_v5 = vld [vmem:[%s1214_s1 + $0x4] sm:$0xf0]  ;;  %v36_v6 = vld [vmem:[%s1213_s0] sm:$0xff]  ;;  %v853_v11 = vld [vmem:[%s1214_s1 + $0x14] sm:$0xf] }
   0x5   :  { %v725_v7 = vor.u32 %v852_v5, %v724_v3  ;;  %v37_v8 = vld [vmem:[%s1213_s0 + $0x8] sm:$0xff]  ;;  %v40_v9 = vld [vmem:[%s1213_s0 + $0x20] sm:$0xff]  ;;  %v734_v12 = vld [vmem:[%s1214_s1 + $0x18] sm:$0xf0] }
   0x6   :  { %121 = vmatpush.bf16.msra.mxu0 %v733_v4  ;;  %879 = vmatpush.bf16.msra.mxu1 %v733_v4  ;;  %v41_v10 = vld [vmem:[%s1213_s0 + $0x28] sm:$0xff]  ;;  %v851_v13 = vld [vmem:[%s1214_s1 + $0x4] sm:$0xf]  ;;  %v737_v14 = vor.u32 %v853_v11, %v734_v12  ;;  %v52_v16 = vpack.c.bf16 %v37_v8, %v36_v6 }
   0x7   :  { %880 = vmatpush.bf16.msra.mxu2 %v733_v4  ;;  %881 = vmatpush.bf16.msra.mxu3 %v733_v4  ;;  %v726_v15 = vld [vmem:[%s1214_s1 + $0x8] sm:$0xf0]  ;;  %v54_v17 = vpack.c.bf16 %v41_v10, %v40_v9 }
   0x8   :  { %16 = vsyncpa [#allocation4], 0  ;;  %vm90_vm0 = vcmask 261120   ;;  %v729_v18 = vor.u32 %v851_v13, %v726_v15  ;;  %v38_v19 = vld [vmem:[%s1213_s0 + $0x10] sm:$0xff]  ;;  %v39_v20 = vld [vmem:[%s1213_s0 + $0x18] sm:$0xff]  ;;  %vm664_vm1 = vcmask 523264  }
   0x9   :  { %v42_v21 = vld [vmem:[%s1213_s0 + $0x30] sm:$0xff]  ;;  %v43_v22 = vld [vmem:[%s1213_s0 + $0x38] sm:$0xff]  ;;  %v53_v23 = vpack.c.bf16 %v39_v20, %v38_v19  ;;  %v44_v25 = vld [vmem:[%s1213_s0 + $0x40] sm:$0xff]  ;;  %s918_s16 = smov [#allocation3]   ;;  %s713_s8 = sshll.u32 %s1222_s9, 4  ;;  %s714_s8 = int_to_ptr.hbm [resolvable:$true] %s713_s8 }
   0xa   :  { %122 = vmatpush.bf16.msra.mxu0 %v725_v7  ;;  %882 = vmatpush.bf16.msra.mxu1 %v725_v7  ;;  %v55_v24 = vpack.c.bf16 %v43_v22, %v42_v21  ;;  %v45_v26 = vld [vmem:[%s1213_s0 + $0x48] sm:$0xff]  ;;  %v46_v28 = vld [vmem:[%s1213_s0 + $0x50] sm:$0xff]  ;;  %v47_v29 = vld [vmem:[%s1213_s0 + $0x58] sm:$0xff]  ;;  %s711_s17 = sshll.u32 %s918_s16, 4  ;;  %s712_s17 = int_to_ptr.vmem [resolvable:$true] %s711_s17 }
   0xb   :  { %883 = vmatpush.bf16.msra.mxu2 %v725_v7  ;;  %884 = vmatpush.bf16.msra.mxu3 %v725_v7  ;;  %v56_v27 = vpack.c.bf16 %v45_v26, %v44_v25  ;;  %v57_v30 = vpack.c.bf16 %v47_v29, %v46_v28  ;;  %v48_v31 = vld [vmem:[%s1213_s0 + $0x60] sm:$0xff]  ;;  %v49_v32 = vld [vmem:[%s1213_s0 + $0x68] sm:$0xff]  ;;  %v862_v33 = vld [vmem:[%s1216_s3 + $0x38] sm:$0xff] }
   0xc   :  { %v58_v34 = vpack.c.bf16 %v49_v32, %v48_v31  ;;  %v861_v35 = vld [vmem:[%s1216_s3 + $0x30] sm:$0xff]  ;;  %v51_v37 = vld [vmem:[%s1213_s0 + $0x78] sm:$0xff]  ;;  %v860_v38 = vld [vmem:[%s1216_s3 + $0x28] sm:$0xff] }
   0xd   :  { %738 = vmatmul.msk.bf16.vlgmr.msra.gmra.mxu0 %vm90_vm0, %v52_v16  ;;  %740 = vmatmul.msk.bf16.vlgmr.msra.gmra.mxu1 %vm90_vm0, %v54_v17  ;;  %v50_v36 = vld [vmem:[%s1213_s0 + $0x70] sm:$0xff]  ;;  %v859_v40 = vld [vmem:[%s1216_s3 + $0x20] sm:$0xff]  ;;  %v858_v41 = vld [vmem:[%s1216_s3 + $0x18] sm:$0xff] }
   0xe   :  { %170 = vmatpush.bf16.msrb.mxu1 %v737_v14  ;;  %742 = vmatmul.msk.bf16.vlgmr.msra.gmra.mxu2 %vm90_vm0, %v56_v27  ;;  %v59_v39 = vpack.c.bf16 %v51_v37, %v50_v36  ;;  %v857_v42 = vld [vmem:[%s1216_s3 + $0x10] sm:$0xff]  ;;  %v856_v43 = vld [vmem:[%s1216_s3 + $0x8] sm:$0xff]  ;;  %v855_v44 = vld [vmem:[%s1216_s3] sm:$0xff] }
   0xf   :  { %393 = vmatpush.bf16.msrb.mxu2 %v862_v33  ;;  %v870_v45 = vld [vmem:[%s1216_s3 + $0x78] sm:$0xff]  ;;  %v869_v46 = vld [vmem:[%s1216_s3 + $0x70] sm:$0xff]  ;;  %v868_v47 = vld [vmem:[%s1216_s3 + $0x68] sm:$0xff] }
  0x10   :  { %745 = vmatmul.msk.bf16.vlgmr.msra.gmra.mxu3 %vm90_vm0, %v59_v39  ;;  %v867_v48 = vld [vmem:[%s1216_s3 + $0x60] sm:$0xff]  ;;  %v866_v49 = vld [vmem:[%s1216_s3 + $0x58] sm:$0xff]  ;;  %v865_v53 = vld [vmem:[%s1216_s3 + $0x50] sm:$0xff] }
  0x11   :  { %442 = vmatpush.bf16.msrb.mxu3 %v870_v45  ;;  %v64_v50 = vld [vmem:[%s1215_s2] sm:$0x3]  ;;  %v864_v56 = vld [vmem:[%s1216_s3 + $0x48] sm:$0xff] }
  0x12   :  { %171 = vmatpush.bf16.msrb.mxu1 %v729_v18  ;;  %v1103_v54 = vperm.slane %v64_v50, 0  ;;  %v863_v61 = vld [vmem:[%s1216_s3 + $0x40] sm:$0xff]  ;;  %v1117_v10 = vperm.slane %v64_v50, 1 }
  0x13   :  { %394 = vmatpush.bf16.msrb.mxu2 %v861_v35 }
  0x15   :  { %443 = vmatpush.bf16.msrb.mxu3 %v869_v46 }
  0x17   :  { %395 = vmatpush.bf16.msrb.mxu2 %v860_v38 }
  0x19   :  { %444 = vmatpush.bf16.msrb.mxu3 %v868_v47 }
  0x1b   :  { %396 = vmatpush.bf16.msrb.mxu2 %v859_v40 }
  0x1d   :  { %739 = vmatmul.msk.bf16.gmra.mxu0 %vm90_vm0, %v53_v23  ;;  %741 = vmatmul.msk.bf16.gmra.mxu1 %vm90_vm0, %v55_v24 }
  0x1e   :  { %743 = vmatmul.msk.bf16.gmra.mxu2 %vm90_vm0, %v57_v30  ;;  %445 = vmatpush.bf16.msrb.mxu3 %v867_v48 }
  0x1f   :  { %397 = vmatpush.bf16.msrb.mxu2 %v858_v41 }
  0x22   :  { %446 = vmatpush.bf16.msrb.mxu3 %v866_v49 }
  0x23   :  { %398 = vmatpush.bf16.msrb.mxu2 %v857_v42 }
  0x26   :  { %447 = vmatpush.bf16.msrb.mxu3 %v865_v53 }
  0x27   :  { %399 = vmatpush.bf16.msrb.mxu2 %v856_v43 }
  0x2a   :  { %448 = vmatpush.bf16.msrb.mxu3 %v864_v56 }
  0x2b   :  { %400 = vmatpush.bf16.msrb.mxu2 %v855_v44 }
  0x2d   :  { %746 = vmatmul.msk.bf16.vlgmr.msrb.gmra.mxu1 %vm90_vm0, %v52_v16 }
  0x2e   :  { %744 = vmatmul.msk.bf16.gmra.mxu2 %vm90_vm0, %v58_v34  ;;  %449 = vmatpush.bf16.msrb.mxu3 %v863_v61 }
  0x3d   :  { %747 = vmatmul.msk.bf16.gmra.mxu1 %vm90_vm0, %v53_v23 }
  0x4d   :  { %748 = vmatmul.msk.bf16.gmra.mxu1 %vm90_vm0, %v54_v17 }
  0x5d   :  { %749 = vmatmul.msk.bf16.gmra.mxu1 %vm90_vm0, %v55_v24 }
  0x6d   :  { %750 = vmatmul.msk.bf16.gmra.mxu1 %vm90_vm0, %v56_v27 }
  0x7d   :  { %751 = vmatmul.msk.bf16.gmra.mxu1 %vm90_vm0, %v57_v30 }
  0x8a   :  { %v124_v51 = vpop.f32.mrf.mxu0  ;;  %v134_v52 = vpop.f32.mrf.mxu1 }
  0x8b   :  { %v125_v55 = vadd.f32 %v124_v51, %v1103_v54  ;;  %v135_v12 = vadd.f32 %v134_v52, %v1103_v54 }
  0x8d   :  { %752 = vmatmul.msk.bf16.gmra.mxu1 %vm90_vm0, %v58_v34  ;;  %v213_v59 = vmax.f32 %v125_v55, 0.0  ;;  %v221_v17 = vmax.f32 %v135_v12, 0.0 }
  0x91   :  { %v144_v22 = vpop.f32.mrf.mxu2 }
  0x92   :  { %v126_v57 = vpop.f32.mrf.mxu0  ;;  %v136_v58 = vpop.f32.mrf.mxu1  ;;  %v145_v38 = vadd.f32 %v144_v22, %v1103_v54 }
  0x93   :  { %v127_v60 = vadd.f32 %v126_v57, %v1103_v54  ;;  %v137_v11 = vadd.f32 %v136_v58, %v1103_v54 }
  0x94   :  { %v229_v41 = vmax.f32 %v145_v38, 0.0 }
  0x95   :  { %v215_v62 = vmax.f32 %v127_v60, 0.0  ;;  %v223_v15 = vmax.f32 %v137_v11, 0.0 }
  0x97   :  { %v245_v63 = vpack.c.bf16 %v215_v62, %v213_v59  ;;  %v249_v21 = vpack.c.bf16 %v223_v15, %v221_v17 }
  0x99   :  { %401 = vmatmul.bf16.vlgmr.msrb.gmra.mxu2 %v245_v63  ;;  %v146_v28 = vpop.f32.mrf.mxu2 }
  0x9a   :  { %v129_v0 = vpop.f32.mrf.mxu0  ;;  %v139_v1 = vpop.f32.mrf.mxu1 }
  0x9b   :  { %v130_v2 = vadd.f32 %v129_v0, %v1103_v54  ;;  %v140_v25 = vadd.f32 %v139_v1, %v1103_v54 }
  0x9d   :  { %753 = vmatmul.msk.bf16.gmra.mxu1 %vm90_vm0, %v59_v39  ;;  %v217_v5 = vmax.f32 %v130_v2, 0.0  ;;  %v225_v31 = vmax.f32 %v140_v25, 0.0  ;;  %v147_v39 = vadd.f32 %v146_v28, %v1103_v54 }
  0x9f   :  { %v231_v42 = vmax.f32 %v147_v39, 0.0  ;;  %v874_v39 = vld [vmem:[%s1218_s5 + $0x18] sm:$0xff] }
  0xa1   :  { %v149_v37 = vpop.f32.mrf.mxu2  ;;  %v253_v47 = vpack.c.bf16 %v231_v42, %v229_v41  ;;  %v873_v41 = vld [vmem:[%s1218_s5 + $0x10] sm:$0xff] }
  0xa2   :  { %v131_v3 = vpop.f32.mrf.mxu0  ;;  %v141_v4 = vpop.f32.mrf.mxu1  ;;  %v150_v51 = vadd.f32 %v149_v37, %v1103_v54 }
  0xa3   :  { %v132_v6 = vadd.f32 %v131_v3, %v1103_v54  ;;  %v142_v24 = vadd.f32 %v141_v4, %v1103_v54  ;;  %v159_v4 = vpop.f32.mrf.mxu3 }
  0xa4   :  { %v233_v56 = vmax.f32 %v150_v51, 0.0  ;;  %v160_v17 = vadd.f32 %v159_v4, %v1103_v54 }
  0xa5   :  { %v219_v7 = vmax.f32 %v132_v6, 0.0  ;;  %v227_v29 = vmax.f32 %v142_v24, 0.0 }
  0xa7   :  { %v247_v8 = vpack.c.bf16 %v219_v7, %v217_v5  ;;  %v251_v34 = vpack.c.bf16 %v227_v29, %v225_v31  ;;  %v878_v29 = vld [vmem:[%s1218_s5 + $0x38] sm:$0xff] }
  0xa8   :  { %583 = vmatpush.bf16.msrb.mxu0 %v878_v29 }
  0xa9   :  { %406 = vmatmul.bf16.gmra.mxu2 %v247_v8  ;;  %v151_v48 = vpop.f32.mrf.mxu2 }
  0xaa   :  { %v173_v9 = vpop.f32.mrf.mxu1  ;;  %v152_v52 = vadd.f32 %v151_v48, %v1103_v54 }
  0xab   :  { %v174_v13 = vadd.f32 %v173_v9, %v1117_v10 }
  0xac   :  { %v235_v57 = vmax.f32 %v152_v52, 0.0 }
  0xad   :  { %v214_v18 = vmax.f32 %v174_v13, 0.0 }
  0xae   :  { %v255_v62 = vpack.c.bf16 %v235_v57, %v233_v56 }
  0xb1   :  { %v154_v53 = vpop.f32.mrf.mxu2 }
  0xb2   :  { %v175_v14 = vpop.f32.mrf.mxu1  ;;  %v155_v2 = vadd.f32 %v154_v53, %v1103_v54 }
  0xb3   :  { %v176_v16 = vadd.f32 %v175_v14, %v1117_v10 }
  0xb4   :  { %v237_v6 = vmax.f32 %v155_v2, 0.0 }
  0xb5   :  { %v216_v19 = vmax.f32 %v176_v16, 0.0  ;;  %v161_v16 = vpop.f32.mrf.mxu3 }
  0xb7   :  { %v246_v20 = vpack.c.bf16 %v216_v19, %v214_v18  ;;  %v162_v18 = vadd.f32 %v161_v16, %v1103_v54 }
  0xb9   :  { %411 = vmatmul.bf16.gmra.mxu2 %v249_v21  ;;  %450 = vmatmul.bf16.vlgmr.msrb.gmra.mxu3 %v246_v20  ;;  %v156_v1 = vpop.f32.mrf.mxu2  ;;  %v241_v20 = vmax.f32 %v160_v17, 0.0  ;;  %v243_v21 = vmax.f32 %v162_v18, 0.0 }
  0xba   :  { %v178_v23 = vpop.f32.mrf.mxu1  ;;  %v157_v3 = vadd.f32 %v156_v1, %v1103_v54  ;;  %v877_v54 = vld [vmem:[%s1218_s5 + $0x30] sm:$0xff] }
  0xbb   :  { %v179_v26 = vadd.f32 %v178_v23, %v1117_v10  ;;  %584 = vmatpush.bf16.msrb.mxu0 %v877_v54 }
  0xbc   :  { %v239_v7 = vmax.f32 %v157_v3, 0.0 }
  0xbd   :  { %v218_v32 = vmax.f32 %v179_v26, 0.0  ;;  %v259_v26 = vpack.c.bf16 %v243_v21, %v241_v20 }
  0xbe   :  { %v257_v13 = vpack.c.bf16 %v239_v7, %v237_v6 }
  0xc2   :  { %v180_v27 = vpop.f32.mrf.mxu1 }
  0xc3   :  { %v181_v30 = vadd.f32 %v180_v27, %v1117_v10 }
  0xc5   :  { %v220_v33 = vmax.f32 %v181_v30, 0.0 }
  0xc7   :  { %v248_v35 = vpack.c.bf16 %v220_v33, %v218_v32  ;;  %v876_v32 = vld [vmem:[%s1218_s5 + $0x28] sm:$0xff] }
  0xc8   :  { %585 = vmatpush.bf16.msrb.mxu0 %v876_v32 }
  0xc9   :  { %416 = vmatmul.bf16.gmra.mxu2 %v251_v34  ;;  %455 = vmatmul.bf16.gmra.mxu3 %v248_v35 }
  0xca   :  { %v183_v36 = vpop.f32.mrf.mxu1 }
  0xcb   :  { %v184_v40 = vadd.f32 %v183_v36, %v1117_v10  ;;  %v875_v36 = vld [vmem:[%s1218_s5 + $0x20] sm:$0xff] }
  0xcc   :  { %586 = vmatpush.bf16.msrb.mxu0 %v875_v36 }
  0xcd   :  { %v222_v45 = vmax.f32 %v184_v40, 0.0 }
  0xd0   :  { %587 = vmatpush.bf16.msrb.mxu0 %v874_v39 }
  0xd2   :  { %v185_v43 = vpop.f32.mrf.mxu1 }
  0xd3   :  { %v186_v44 = vadd.f32 %v185_v43, %v1117_v10 }
  0xd4   :  { %588 = vmatpush.bf16.msrb.mxu0 %v873_v41 }
  0xd5   :  { %v224_v46 = vmax.f32 %v186_v44, 0.0  ;;  %v872_v44 = vld [vmem:[%s1218_s5 + $0x8] sm:$0xff] }
  0xd7   :  { %v250_v49 = vpack.c.bf16 %v224_v46, %v222_v45 }
  0xd8   :  { %589 = vmatpush.bf16.msrb.mxu0 %v872_v44 }
  0xd9   :  { %460 = vmatmul.bf16.gmra.mxu3 %v250_v49  ;;  %421 = vmatmul.bf16.gmra.mxu2 %v253_v47  ;;  %v871_v49 = vld [vmem:[%s1218_s5] sm:$0xff] }
  0xda   :  { %v188_v50 = vpop.f32.mrf.mxu1 }
  0xdb   :  { %v189_v55 = vadd.f32 %v188_v50, %v1117_v10 }
  0xdc   :  { %590 = vmatpush.bf16.msrb.mxu0 %v871_v49 }
  0xdd   :  { %v226_v60 = vmax.f32 %v189_v55, 0.0  ;;  %v1174_v55 = vld [vmem:[%s1217_s4] ss:$0 sm:$0xff] }
  0xe2   :  { %v190_v58 = vpop.f32.mrf.mxu1 }
  0xe3   :  { %v191_v59 = vadd.f32 %v190_v58, %v1117_v10 }
  0xe5   :  { %v228_v61 = vmax.f32 %v191_v59, 0.0 }
  0xe7   :  { %v252_v63 = vpack.c.bf16 %v228_v61, %v226_v60 }
  0xe9   :  { %465 = vmatmul.bf16.gmra.mxu3 %v252_v63  ;;  %426 = vmatmul.bf16.gmra.mxu2 %v255_v62 }
  0xea   :  { %v193_v0 = vpop.f32.mrf.mxu1 }
  0xeb   :  { %v194_v5 = vadd.f32 %v193_v0, %v1117_v10 }
  0xed   :  { %v230_v11 = vmax.f32 %v194_v5, 0.0 }
  0xf2   :  { %v195_v8 = vpop.f32.mrf.mxu1 }
  0xf3   :  { %v196_v9 = vadd.f32 %v195_v8, %v1117_v10 }
  0xf5   :  { %v232_v12 = vmax.f32 %v196_v9, 0.0 }
  0xf7   :  { %v254_v14 = vpack.c.bf16 %v232_v12, %v230_v11 }
  0xf9   :  { %470 = vmatmul.bf16.gmra.mxu3 %v254_v14  ;;  %431 = vmatmul.bf16.gmra.mxu2 %v257_v13 }
  0xfa   :  { %v198_v15 = vpop.f32.mrf.mxu1 }
  0xfb   :  { %v199_v19 = vadd.f32 %v198_v15, %v1117_v10 }
  0xfd   :  { %v234_v24 = vmax.f32 %v199_v19, 0.0 }
 0x102   :  { %v200_v22 = vpop.f32.mrf.mxu1 }
 0x103   :  { %v201_v23 = vadd.f32 %v200_v22, %v1117_v10 }
 0x105   :  { %v236_v25 = vmax.f32 %v201_v23, 0.0 }
 0x107   :  { %v256_v27 = vpack.c.bf16 %v236_v25, %v234_v24 }
 0x109   :  { %475 = vmatmul.bf16.gmra.mxu3 %v256_v27  ;;  %436 = vmatmul.bf16.gmra.mxu2 %v259_v26 }
 0x10a   :  { %v203_v28 = vpop.f32.mrf.mxu1 }
 0x10b   :  { %v204_v30 = vadd.f32 %v203_v28, %v1117_v10 }
 0x10d   :  { %v238_v34 = vmax.f32 %v204_v30, 0.0 }
 0x112   :  { %v205_v31 = vpop.f32.mrf.mxu1 }
 0x113   :  { %v206_v33 = vadd.f32 %v205_v31, %v1117_v10 }
 0x115   :  { %v240_v35 = vmax.f32 %v206_v33, 0.0 }
 0x117   :  { %v258_v37 = vpack.c.bf16 %v240_v35, %v238_v34 }
 0x119   :  { %480 = vmatmul.bf16.gmra.mxu3 %v258_v37 }
 0x11a   :  { %v208_v38 = vpop.f32.mrf.mxu1 }
 0x11b   :  { %v209_v42 = vadd.f32 %v208_v38, %v1117_v10 }
 0x11c   :  { %v402_v40 = vpop.f32.mrf.mxu2 }
 0x11d   :  { %v242_v46 = vmax.f32 %v209_v42, 0.0 }
 0x122   :  { %v210_v43 = vpop.f32.mrf.mxu1 }
 0x123   :  { %v211_v45 = vadd.f32 %v210_v43, %v1117_v10  ;;  %v403_v10 = vadd.f32 %v1174_v55, %v402_v40 }
 0x124   :  { %v404_v48 = vpop.f32.mrf.mxu2 }
 0x125   :  { %v244_v47 = vmax.f32 %v211_v45, 0.0  ;;  %v405_v56 = vadd.f32 %v1174_v55, %v404_v48 }
 0x127   :  { %v260_v50 = vpack.c.bf16 %v244_v47, %v242_v46 }
 0x129   :  { %485 = vmatmul.bf16.gmra.mxu3 %v260_v50 }
 0x12c   :  { %v407_v51 = vpop.f32.mrf.mxu2 }
 0x12d   :  { %v408_v2 = vadd.f32 %v1174_v55, %v407_v51 }
 0x134   :  { %v409_v52 = vpop.f32.mrf.mxu2 }
 0x135   :  { %v410_v3 = vadd.f32 %v1174_v55, %v409_v52 }
 0x13c   :  { %v451_v53 = vpop.f32.mrf.mxu3  ;;  %v412_v58 = vpop.f32.mrf.mxu2 }
 0x13d   :  { %v452_v57 = vadd.f32 %v451_v53, %v403_v10  ;;  %v413_v13 = vadd.f32 %v1174_v55, %v412_v58 }
 0x13f   :  { %v491_v61 = vmax.f32 %v452_v57, 0.0 }
 0x144   :  { %v453_v59 = vpop.f32.mrf.mxu3  ;;  %v414_v1 = vpop.f32.mrf.mxu2 }
 0x145   :  { %v454_v60 = vadd.f32 %v453_v59, %v405_v56  ;;  %v415_v15 = vadd.f32 %v1174_v55, %v414_v1 }
 0x147   :  { %v492_v62 = vmax.f32 %v454_v60, 0.0 }
 0x149   :  { %v507_v63 = vpack.c.bf16 %v492_v62, %v491_v61 }
 0x14b   :  { %591 = vmatmul.bf16.vlgmr.msrb.gmra.mxu0 %v507_v63 }
 0x14c   :  { %v456_v0 = vpop.f32.mrf.mxu3  ;;  %v417_v9 = vpop.f32.mrf.mxu2 }
 0x14d   :  { %v457_v4 = vadd.f32 %v456_v0, %v408_v2  ;;  %v418_v24 = vadd.f32 %v1174_v55, %v417_v9 }
 0x14f   :  { %v493_v7 = vmax.f32 %v457_v4, 0.0 }
 0x154   :  { %v458_v5 = vpop.f32.mrf.mxu3  ;;  %v419_v14 = vpop.f32.mrf.mxu2 }
 0x155   :  { %v459_v6 = vadd.f32 %v458_v5, %v410_v3  ;;  %v420_v25 = vadd.f32 %v1174_v55, %v419_v14 }
 0x157   :  { %v494_v8 = vmax.f32 %v459_v6, 0.0 }
 0x159   :  { %v508_v11 = vpack.c.bf16 %v494_v8, %v493_v7 }
 0x15b   :  { %596 = vmatmul.bf16.gmra.mxu0 %v508_v11 }
 0x15c   :  { %v461_v12 = vpop.f32.mrf.mxu3  ;;  %v422_v22 = vpop.f32.mrf.mxu2 }
 0x15d   :  { %v462_v16 = vadd.f32 %v461_v12, %v413_v13  ;;  %v423_v34 = vadd.f32 %v1174_v55, %v422_v22  ;;  %v889_v13 = vld [vmem:[%s1219_s6] ss:$0 sm:$0xff] }
 0x15f   :  { %v495_v19 = vmax.f32 %v462_v16, 0.0 }
 0x164   :  { %v463_v17 = vpop.f32.mrf.mxu3  ;;  %v424_v27 = vpop.f32.mrf.mxu2 }
 0x165   :  { %v464_v18 = vadd.f32 %v463_v17, %v415_v15  ;;  %v425_v35 = vadd.f32 %v1174_v55, %v424_v27 }
 0x167   :  { %v496_v20 = vmax.f32 %v464_v18, 0.0 }
 0x169   :  { %v509_v21 = vpack.c.bf16 %v496_v20, %v495_v19 }
 0x16b   :  { %601 = vmatmul.bf16.gmra.mxu0 %v509_v21 }
 0x16c   :  { %v466_v23 = vpop.f32.mrf.mxu3  ;;  %v427_v33 = vpop.f32.mrf.mxu2 }
 0x16d   :  { %v467_v26 = vadd.f32 %v466_v23, %v418_v24  ;;  %v428_v44 = vadd.f32 %v1174_v55, %v427_v33 }
 0x16f   :  { %v497_v54 = vmax.f32 %v467_v26, 0.0 }
 0x174   :  { %v468_v28 = vpop.f32.mrf.mxu3  ;;  %v429_v41 = vpop.f32.mrf.mxu2 }
 0x175   :  { %v469_v29 = vadd.f32 %v468_v28, %v420_v25  ;;  %v430_v46 = vadd.f32 %v1174_v55, %v429_v41 }
 0x177   :  { %v498_v30 = vmax.f32 %v469_v29, 0.0 }
 0x179   :  { %v510_v31 = vpack.c.bf16 %v498_v30, %v497_v54 }
 0x17b   :  { %606 = vmatmul.bf16.gmra.mxu0 %v510_v31 }
 0x17c   :  { %v471_v32 = vpop.f32.mrf.mxu3  ;;  %v432_v45 = vpop.f32.mrf.mxu2 }
 0x17d   :  { %v472_v36 = vadd.f32 %v471_v32, %v423_v34  ;;  %v433_v56 = vadd.f32 %v1174_v55, %v432_v45 }
 0x17f   :  { %v499_v39 = vmax.f32 %v472_v36, 0.0 }
 0x184   :  { %v473_v37 = vpop.f32.mrf.mxu3  ;;  %v434_v53 = vpop.f32.mrf.mxu2 }
 0x185   :  { %v474_v38 = vadd.f32 %v473_v37, %v425_v35  ;;  %v435_v57 = vadd.f32 %v1174_v55, %v434_v53 }
 0x187   :  { %v500_v40 = vmax.f32 %v474_v38, 0.0 }
 0x189   :  { %v511_v42 = vpack.c.bf16 %v500_v40, %v499_v39 }
 0x18b   :  { %611 = vmatmul.bf16.gmra.mxu0 %v511_v42 }
 0x18c   :  { %v476_v43 = vpop.f32.mrf.mxu3  ;;  %v437_v61 = vpop.f32.mrf.mxu2 }
 0x18d   :  { %v477_v47 = vadd.f32 %v476_v43, %v428_v44  ;;  %v438_v3 = vadd.f32 %v1174_v55, %v437_v61 }
 0x18f   :  { %v501_v50 = vmax.f32 %v477_v47, 0.0 }
 0x194   :  { %v478_v48 = vpop.f32.mrf.mxu3  ;;  %v439_v2 = vpop.f32.mrf.mxu2 }
 0x195   :  { %v479_v49 = vadd.f32 %v478_v48, %v430_v46  ;;  %v440_v4 = vadd.f32 %v1174_v55, %v439_v2 }
 0x197   :  { %v502_v51 = vmax.f32 %v479_v49, 0.0 }
 0x199   :  { %v512_v52 = vpack.c.bf16 %v502_v51, %v501_v50 }
 0x19b   :  { %616 = vmatmul.bf16.gmra.mxu0 %v512_v52 }
 0x19c   :  { %v481_v10 = vpop.f32.mrf.mxu3 }
 0x19d   :  { %v482_v58 = vadd.f32 %v481_v10, %v433_v56 }
 0x19f   :  { %v503_v62 = vmax.f32 %v482_v58, 0.0 }
 0x1a4   :  { %v483_v59 = vpop.f32.mrf.mxu3 }
 0x1a5   :  { %v484_v60 = vadd.f32 %v483_v59, %v435_v57 }
 0x1a7   :  { %v504_v63 = vmax.f32 %v484_v60, 0.0 }
 0x1a9   :  { %v513_v0 = vpack.c.bf16 %v504_v63, %v503_v62 }
 0x1ab   :  { %621 = vmatmul.bf16.gmra.mxu0 %v513_v0 }
 0x1ac   :  { %v486_v1 = vpop.f32.mrf.mxu3 }
 0x1ad   :  { %v487_v5 = vadd.f32 %v486_v1, %v438_v3 }
 0x1af   :  { %v505_v8 = vmax.f32 %v487_v5, 0.0 }
 0x1b4   :  { %v488_v6 = vpop.f32.mrf.mxu3 }
 0x1b5   :  { %v489_v7 = vadd.f32 %v488_v6, %v440_v4 }
 0x1b7   :  { %v506_v9 = vmax.f32 %v489_v7, 0.0 }
 0x1b9   :  { %v514_v11 = vpack.c.bf16 %v506_v9, %v505_v8  ;;  %v890_v9 = vld [vmem:[#allocation2] ss:$0 sm:$0xff] }
 0x1bb   :  { %626 = vmatmul.bf16.gmra.mxu0 %v514_v11  ;;  %v917_v11 = vmov 0  }
 0x1bc   :  { %887 = vset.pattern.permute.xlu0 %v917_v11 }
 0x1bd   :  { %661 = vperm.xlu0 %887, %v890_v9  }
 0x1c8   :  { %v592_v12 = vpop.f32.mrf.mxu0 }
 0x1c9   :  { %v593_v14 = vadd.f32 %v889_v13, %v592_v12 }
 0x1cb   :  { %v632_v17 = vmax.f32 %v593_v14, 0.0 }
 0x1d0   :  { %v594_v15 = vpop.f32.mrf.mxu0 }
 0x1d1   :  { %v595_v16 = vadd.f32 %v889_v13, %v594_v15  ;;  %v648_v15 = vld [vmem:[%s1220_s7] sm:$0xf] }
 0x1d3   :  { %v633_v18 = vmax.f32 %v595_v16, 0.0 }
 0x1d5   :  { %v1195_v19 = vpack.c.bf16 %v633_v18, %v632_v17 }
 0x1d7   :  { %v669_v14 = vsel %vm664_vm1, %v1195_v19, 0 }
 0x1d8   :  { %v597_v55 = vpop.f32.mrf.mxu0 }
 0x1d9   :  { %v598_v20 = vadd.f32 %v889_v13, %v597_v55 }
 0x1db   :  { %v634_v23 = vmax.f32 %v598_v20, 0.0 }
 0x1e0   :  { %v599_v21 = vpop.f32.mrf.mxu0 }
 0x1e1   :  { %v600_v22 = vadd.f32 %v889_v13, %v599_v21 }
 0x1e3   :  { %v635_v24 = vmax.f32 %v600_v22, 0.0 }
 0x1e5   :  { %v650_v25 = vpack.c.bf16 %v635_v24, %v634_v23 }
 0x1e8   :  { %v602_v26 = vpop.f32.mrf.mxu0 }
 0x1e9   :  { %v603_v27 = vadd.f32 %v889_v13, %v602_v26 }
 0x1eb   :  { %v636_v54 = vmax.f32 %v603_v27, 0.0 }
 0x1f0   :  { %v604_v28 = vpop.f32.mrf.mxu0 }
 0x1f1   :  { %v605_v29 = vadd.f32 %v889_v13, %v604_v28 }
 0x1f3   :  { %v637_v30 = vmax.f32 %v605_v29, 0.0 }
 0x1f5   :  { %v651_v31 = vpack.c.bf16 %v637_v30, %v636_v54 }
 0x1f7   :  { %v675_v12 = vsel %vm664_vm1, %v651_v31, 0 }
 0x1f8   :  { %v607_v32 = vpop.f32.mrf.mxu0 }
 0x1f9   :  { %v608_v33 = vadd.f32 %v889_v13, %v607_v32 }
 0x1fb   :  { %v638_v36 = vmax.f32 %v608_v33, 0.0 }
 0x200   :  { %v609_v34 = vpop.f32.mrf.mxu0 }
 0x201   :  { %v610_v35 = vadd.f32 %v889_v13, %v609_v34 }
 0x203   :  { %v639_v37 = vmax.f32 %v610_v35, 0.0 }
 0x205   :  { %v652_v38 = vpack.c.bf16 %v639_v37, %v638_v36 }
 0x207   :  { %v678_v8 = vsel %vm664_vm1, %v652_v38, 0 }
 0x208   :  { %v612_v39 = vpop.f32.mrf.mxu0 }
 0x209   :  { %v613_v40 = vadd.f32 %v889_v13, %v612_v39 }
 0x20b   :  { %v640_v43 = vmax.f32 %v613_v40, 0.0 }
 0x210   :  { %v614_v41 = vpop.f32.mrf.mxu0 }
 0x211   :  { %v615_v42 = vadd.f32 %v889_v13, %v614_v41 }
 0x213   :  { %v641_v44 = vmax.f32 %v615_v42, 0.0 }
 0x215   :  { %v653_v45 = vpack.c.bf16 %v641_v44, %v640_v43 }
 0x217   :  { %v681_v7 = vsel %vm664_vm1, %v653_v45, 0 }
 0x218   :  { %v617_v46 = vpop.f32.mrf.mxu0 }
 0x219   :  { %v618_v1 = vadd.f32 %v889_v13, %v617_v46 }
 0x21b   :  { %v642_v4 = vmax.f32 %v618_v1, 0.0 }
 0x220   :  { %v619_v47 = vpop.f32.mrf.mxu0 }
 0x221   :  { %v620_v63 = vadd.f32 %v889_v13, %v619_v47 }
 0x223   :  { %v643_v2 = vmax.f32 %v620_v63, 0.0 }
 0x225   :  { %v654_v5 = vpack.c.bf16 %v643_v2, %v642_v4 }
 0x227   :  { %v684_v6 = vsel %vm664_vm1, %v654_v5, 0 }
 0x228   :  { %v622_v48 = vpop.f32.mrf.mxu0 }
 0x229   :  { %v623_v58 = vadd.f32 %v889_v13, %v622_v48 }
 0x22b   :  { %v644_v62 = vmax.f32 %v623_v58, 0.0 }
 0x22f   :  { %v662_v16 = vpop.permute.xlu0 %661 }
 0x230   :  { %v624_v49 = vpop.f32.mrf.mxu0 }
 0x231   :  { %v625_v10 = vadd.f32 %v889_v13, %v624_v49 }
 0x233   :  { %v645_v60 = vmax.f32 %v625_v10, 0.0 }
 0x235   :  { %v655_v0 = vpack.c.bf16 %v645_v60, %v644_v62 }
 0x237   :  { %v687_v3 = vsel %vm664_vm1, %v655_v0, 0 }
 0x238   :  { %v627_v50 = vpop.f32.mrf.mxu0 }
 0x239   :  { %v628_v51 = vadd.f32 %v889_v13, %v627_v50 }
 0x23b   :  { %v646_v56 = vmax.f32 %v628_v51, 0.0 }
 0x240   :  { %v629_v52 = vpop.f32.mrf.mxu0 }
 0x241   :  { %v630_v53 = vadd.f32 %v889_v13, %v629_v52  ;;  %v672_v13 = vsel %vm664_vm1, %v650_v25, 0 }
 0x243   :  { %v647_v57 = vmax.f32 %v630_v53, 0.0 }
 0x245   :  { %v656_v59 = vpack.c.bf16 %v647_v57, %v646_v56 }
 0x247   :  { %v690_v61 = vsel %vm664_vm1, %v656_v59, 0 }
 0x248   :  { %692 = vmatpush.bf16.xpose.msra.mxu1 %v690_v61 }
 0x250   :  { %693 = vmatpush.bf16.xpose.msra.mxu1 %v687_v3 }
 0x258   :  { %694 = vmatpush.bf16.xpose.msra.mxu1 %v684_v6 }
 0x260   :  { %695 = vmatpush.bf16.xpose.msra.mxu1 %v681_v7 }
 0x268   :  { %696 = vmatpush.bf16.xpose.msra.mxu1 %v678_v8 }
 0x270   :  { %697 = vmatpush.bf16.xpose.msra.mxu1 %v675_v12 }
 0x278   :  { %698 = vmatpush.bf16.xpose.msra.mxu1 %v672_v13 }
 0x280   :  { %699 = vmatpush.bf16.xpose.msra.mxu1 %v669_v14 }
 0x287   :  { %850 = vmatmul.msk.bf16.vlgmr.msra.gmra.mxu1 %vm664_vm1, %v648_v15 }
 0x304   :  { %v701_v17 = vpop.f32.mrf.mxu1 }
 0x305   :  { %v702_v18 = vadd.f32 %v701_v17, %v662_v16 }
 0x307   :  { %705 = vst [vmem:[#allocation3] sm:$0xff] %v702_v18 }
 0x308   :  { %716 = dma.vmem_to_hbm [thread:$0]  %s712_s17, 128, %s714_s8, [#allocation4]  }
 0x30c   :  { %v703_v19 = vpop.f32.mrf.mxu1 }
 0x30d   :  { %915 = dma.done.wait [#allocation4], 128  }
 0x30e   :  { %916 = vsyncadd [#allocation4], 4294967168 }
 0x30f   :  { %721 = vsyncpa [#allocation4], 1 }

</bundles_post_ra>
